<compile_context>
chip_gen: v5e
topology: v5e:2x2
jax: 0.10.0
libtpu: 0.0.40
codegen_flags: <defaults>
</compile_context>

<pallas_src>
import functools

import jax
import jax.numpy as jnp
from jax.experimental import pallas as pl
from jax.experimental.pallas import tpu as pltpu


_LANE = 128     # lane width: feature dims padded to a multiple of this
_SUBLANE = 8    # sublane width: batch tiles are a multiple of this


def _round_up(x, m):
    return (x + m - 1) // m * m


# --------------------------------------------------------------------------
# Kernel: entire MLP, one grid step per batch tile.
# refs = (w0, b0, w1, b1, ..., o_ref); weights are bf16, biases f32.
# --------------------------------------------------------------------------
def _fused_mlp_kernel(x_ref, *refs, n_layers, neg_slope):
    o_ref = refs[-1]
    h = x_ref[...]                                        # (TILE_B, D0) bf16
    for l in range(n_layers):
        w = refs[2 * l][...]                              # (D_l, D_{l+1}) bf16
        b = refs[2 * l + 1][...]                          # (1,   D_{l+1}) f32
        # bf16 x bf16 on the MXU, f32 accumulation; bias/activation in f32.
        acc = jnp.dot(h.astype(jnp.bfloat16), w,
                      preferred_element_type=jnp.float32) + b
        if l < n_layers - 1:                              # hidden layers only
            acc = jnp.where(acc >= 0, acc, jnp.float32(neg_slope) * acc)
        h = acc
    o_ref[...] = h.astype(o_ref.dtype)


# --------------------------------------------------------------------------
# One-time parameter preparation (kept OUT of the per-call hot path).
# Weights stored transposed (in, out) and zero-padded to lane multiples, bf16.
# --------------------------------------------------------------------------
def prepare_params(params, n_inputs):
    dims = [n_inputs] + [w.shape[1] for (w, _) in params]
    pdims = [_round_up(d, _LANE) for d in dims]
    padded = []
    for l, (w, b) in enumerate(params):
        w_p = jnp.pad(w.astype(jnp.bfloat16),
                      ((0, pdims[l] - w.shape[0]),
                       (0, pdims[l + 1] - w.shape[1])))
        b_p = jnp.pad(b.astype(jnp.float32),
                      (0, pdims[l + 1] - b.shape[0])).reshape(1, -1)
        padded += [w_p, b_p]
    return tuple(padded), pdims


def _pick_batch_tile(B, pdims):
    cap = 512                      # large tiles amortize per-grid-step overhead
    if B <= _SUBLANE:
        tile_b = _SUBLANE
    else:
        # Aim for >= 2 grid steps so v7x's two TensorCores both get work.
        half = _round_up((B + 1) // 2, _SUBLANE)
        tile_b = min(cap, half)
    # Shrink if the f32 activation working set would dominate VMEM (rare).
    max_d = max(pdims)
    while tile_b > _SUBLANE and 6 * tile_b * max_d * 4 > (24 << 20):
        tile_b = _round_up(tile_b // 2, _SUBLANE)
    b_pad = _round_up(B, tile_b)
    return tile_b, b_pad


def _vmem_budget_bytes(tile_b, pdims, single_buffer_weights):
    n_layers = len(pdims) - 1
    wbufs = 1 if single_buffer_weights else 2
    weight_bytes = sum(pdims[l] * pdims[l + 1] * 2 + pdims[l + 1] * 4
                       for l in range(n_layers)) * wbufs
    io_bytes = 2 * (tile_b * pdims[0] * 2 + tile_b * pdims[-1] * 4)  # 2x-buffered x/out tiles
    act_bytes = 4 * tile_b * max(pdims) * 4                          # f32 activation headroom
    est = int((weight_bytes + io_bytes + act_bytes) * 1.25) + (2 << 20)
    # Never below the default scoped limit; cap at v7x physical VMEM.
    return min(max(est, 32 << 20), 64 << 20)


# --------------------------------------------------------------------------
# Wrapper: pads x, builds specs, runs the fused kernel, slices off padding.
# --------------------------------------------------------------------------
def mlp_forward(x, padded_params, n_out, neg_slope, *, single_buffer_weights=True):
    B, n_in = x.shape
    n_layers = len(padded_params) // 2
    pdims = [padded_params[0].shape[0]] + [padded_params[2 * l].shape[1]
                                           for l in range(n_layers)]

    tile_b, b_pad = _pick_batch_tile(B, pdims)
    x_p = jnp.pad(x.astype(jnp.bfloat16),
                  ((0, b_pad - B), (0, pdims[0] - n_in)))

    grid = (b_pad // tile_b,)
    # Constant-index weights/biases: single-buffered (they never change).
    w_mode = pl.Buffered(1) if single_buffer_weights else None

    in_specs = [pl.BlockSpec((tile_b, pdims[0]), lambda i: (i, 0))]
    for l in range(n_layers):
        in_specs.append(pl.BlockSpec((pdims[l], pdims[l + 1]),
                                     lambda i: (0, 0), pipeline_mode=w_mode))
        in_specs.append(pl.BlockSpec((1, pdims[l + 1]),
                                     lambda i: (0, 0), pipeline_mode=w_mode))
    out_spec = pl.BlockSpec((tile_b, pdims[-1]), lambda i: (i, 0))

    kernel = functools.partial(
        _fused_mlp_kernel, n_layers=n_layers, neg_slope=float(neg_slope))

    out_p = pl.pallas_call(
        kernel,
        out_shape=jax.ShapeDtypeStruct((b_pad, pdims[-1]), jnp.float32),
        grid=grid,
        in_specs=in_specs,
        out_specs=out_spec,
        compiler_params=pltpu.CompilerParams(
            dimension_semantics=("parallel",),          # batch tiles independent
            vmem_limit_bytes=_vmem_budget_bytes(tile_b, pdims,
                                                single_buffer_weights),
        ),
    )(x_p, *padded_params)

    return out_p[:B, :n_out]


def init_mlp_params(key, n_inputs, n_hidden, n_classes):
    """Deterministic init mirroring nn.Linear's shapes/scheme.
    Returns [(W_transposed (in, out), b (out,))] per Linear layer."""
    dims_in = [n_inputs] + list(n_hidden)
    dims_out = list(n_hidden) + [n_classes]
    params = []
    for din, dout in zip(dims_in, dims_out):
        key, kw, kb = jax.random.split(key, 3)
        bound = 1.0 / jnp.sqrt(jnp.float32(din))
        w = jax.random.uniform(kw, (din, dout), jnp.float32, -bound, bound)
        b = jax.random.uniform(kb, (dout,), jnp.float32, -bound, bound)
        params.append((w, b))
    return params


if __name__ == "__main__":
    # Small shapes consistent with the module: x is (batch, n_inputs).
    batch = 8
    n_inputs = 32
    n_hidden = (64, 32)
    n_classes = 16
    neg_slope = 0.02

    key = jax.random.PRNGKey(0)
    key, kx = jax.random.split(key)
    x = jax.random.normal(kx, (batch, n_inputs), jnp.float32)

    params = init_mlp_params(key, n_inputs, n_hidden, n_classes)
    padded_params, _ = prepare_params(params, n_inputs)   # one-time, out of hot path

    try:
        out = mlp_forward(x, padded_params, n_classes, neg_slope,
                          single_buffer_weights=True)
    except Exception:
        # Fallback if pipeline_mode=pl.Buffered(1) is unsupported on this
        # jax build: default double-buffering of the (constant) weight blocks.
        out = mlp_forward(x, padded_params, n_classes, neg_slope,
                          single_buffer_weights=False)
    out = jax.block_until_ready(out)

    # Pure-JAX f32 reference of the same math.  Kernel matmuls run in bf16,
    # so tolerances are loosened accordingly.
    ref = x
    for i, (w, b) in enumerate(params):
        ref = ref @ w + b
        if i < len(params) - 1:
            ref = jnp.where(ref >= 0, ref, neg_slope * ref)
    assert out.shape == (batch, n_classes)
    assert jnp.allclose(out, ref, atol=5e-2, rtol=5e-2), \
        float(jnp.max(jnp.abs(out - ref)))

    print("KERNEL_OK")
</pallas_src>

<mosaic_0001>
module attributes {stable_mosaic.version = 11 : i64} {
  func.func @_fused_mlp_kernel(%arg0: i32, %arg1: memref<8x128xbf16, #tpu.memory_space<vmem>>, %arg2: memref<128x128xbf16, #tpu.memory_space<vmem>>, %arg3: memref<1x128xf32, #tpu.memory_space<vmem>>, %arg4: memref<128x128xbf16, #tpu.memory_space<vmem>>, %arg5: memref<1x128xf32, #tpu.memory_space<vmem>>, %arg6: memref<128x128xbf16, #tpu.memory_space<vmem>>, %arg7: memref<1x128xf32, #tpu.memory_space<vmem>>, %arg8: memref<8x128xf32, #tpu.memory_space<vmem>>) attributes {dimension_semantics = [#tpu.dimension_semantics<parallel>], iteration_bounds = array<i64: 1>, scalar_prefetch = 0 : i64, scratch_operands = 0 : i64, tpu.core_type = #tpu.core_type<tc>, window_params = [{transform_indices = @transform_0, window_bounds = array<i64: 8, 128>}, {pipeline_mode = #tpu.pipeline_mode<synchronous>, transform_indices = @transform_1, window_bounds = array<i64: 128, 128>}, {pipeline_mode = #tpu.pipeline_mode<synchronous>, transform_indices = @transform_2, window_bounds = array<i64: 1, 128>}, {pipeline_mode = #tpu.pipeline_mode<synchronous>, transform_indices = @transform_3, window_bounds = array<i64: 128, 128>}, {pipeline_mode = #tpu.pipeline_mode<synchronous>, transform_indices = @transform_4, window_bounds = array<i64: 1, 128>}, {pipeline_mode = #tpu.pipeline_mode<synchronous>, transform_indices = @transform_5, window_bounds = array<i64: 128, 128>}, {pipeline_mode = #tpu.pipeline_mode<synchronous>, transform_indices = @transform_6, window_bounds = array<i64: 1, 128>}, {transform_indices = @transform_7, window_bounds = array<i64: 8, 128>}]} {
    %c0 = arith.constant 0 : index
    %c0_0 = arith.constant 0 : index
    %0 = vector.load %arg1[%c0, %c0_0] : memref<8x128xbf16, #tpu.memory_space<vmem>>, vector<8x128xbf16>
    %c0_1 = arith.constant 0 : index
    %c0_2 = arith.constant 0 : index
    %1 = vector.load %arg2[%c0_1, %c0_2] : memref<128x128xbf16, #tpu.memory_space<vmem>>, vector<128x128xbf16>
    %c0_3 = arith.constant 0 : index
    %c0_4 = arith.constant 0 : index
    %2 = vector.load %arg3[%c0_3, %c0_4] : memref<1x128xf32, #tpu.memory_space<vmem>>, vector<1x128xf32>
    %cst = arith.constant dense<0.000000e+00> : vector<8x128xf32>
    %3 = tpu.matmul %0, %1, %cst {dimension_numbers = #tpu.dot_dimension_numbers<[1], [0], [0], [1], [0, 0, 1, 1], [], []>} : vector<8x128xbf16>, vector<128x128xbf16>, vector<8x128xf32> -> vector<8x128xf32>
    %4 = vector.broadcast %2 : vector<1x128xf32> to vector<8x128xf32>
    %5 = arith.addf %3, %4 : vector<8x128xf32>
    %cst_5 = arith.constant 0.000000e+00 : f32
    %6 = vector.broadcast %cst_5 : f32 to vector<8x128xf32>
    %7 = arith.cmpf oge, %5, %6 : vector<8x128xf32>
    %cst_6 = arith.constant 2.000000e-02 : f32
    %8 = vector.broadcast %cst_6 : f32 to vector<8x128xf32>
    %9 = arith.mulf %8, %5 : vector<8x128xf32>
    %10 = arith.select %7, %5, %9 : vector<8x128xi1>, vector<8x128xf32>
    %c0_7 = arith.constant 0 : index
    %c0_8 = arith.constant 0 : index
    %11 = vector.load %arg4[%c0_7, %c0_8] : memref<128x128xbf16, #tpu.memory_space<vmem>>, vector<128x128xbf16>
    %c0_9 = arith.constant 0 : index
    %c0_10 = arith.constant 0 : index
    %12 = vector.load %arg5[%c0_9, %c0_10] : memref<1x128xf32, #tpu.memory_space<vmem>>, vector<1x128xf32>
    %13 = arith.truncf %10 : vector<8x128xf32> to vector<8x128xbf16>
    %cst_11 = arith.constant dense<0.000000e+00> : vector<8x128xf32>
    %14 = tpu.matmul %13, %11, %cst_11 {dimension_numbers = #tpu.dot_dimension_numbers<[1], [0], [0], [1], [0, 0, 1, 1], [], []>} : vector<8x128xbf16>, vector<128x128xbf16>, vector<8x128xf32> -> vector<8x128xf32>
    %15 = vector.broadcast %12 : vector<1x128xf32> to vector<8x128xf32>
    %16 = arith.addf %14, %15 : vector<8x128xf32>
    %cst_12 = arith.constant 0.000000e+00 : f32
    %17 = vector.broadcast %cst_12 : f32 to vector<8x128xf32>
    %18 = arith.cmpf oge, %16, %17 : vector<8x128xf32>
    %cst_13 = arith.constant 2.000000e-02 : f32
    %19 = vector.broadcast %cst_13 : f32 to vector<8x128xf32>
    %20 = arith.mulf %19, %16 : vector<8x128xf32>
    %21 = arith.select %18, %16, %20 : vector<8x128xi1>, vector<8x128xf32>
    %c0_14 = arith.constant 0 : index
    %c0_15 = arith.constant 0 : index
    %22 = vector.load %arg6[%c0_14, %c0_15] : memref<128x128xbf16, #tpu.memory_space<vmem>>, vector<128x128xbf16>
    %c0_16 = arith.constant 0 : index
    %c0_17 = arith.constant 0 : index
    %23 = vector.load %arg7[%c0_16, %c0_17] : memref<1x128xf32, #tpu.memory_space<vmem>>, vector<1x128xf32>
    %24 = arith.truncf %21 : vector<8x128xf32> to vector<8x128xbf16>
    %cst_18 = arith.constant dense<0.000000e+00> : vector<8x128xf32>
    %25 = tpu.matmul %24, %22, %cst_18 {dimension_numbers = #tpu.dot_dimension_numbers<[1], [0], [0], [1], [0, 0, 1, 1], [], []>} : vector<8x128xbf16>, vector<128x128xbf16>, vector<8x128xf32> -> vector<8x128xf32>
    %26 = vector.broadcast %23 : vector<1x128xf32> to vector<8x128xf32>
    %27 = arith.addf %25, %26 : vector<8x128xf32>
    %c0_19 = arith.constant 0 : index
    %c0_20 = arith.constant 0 : index
    %28 = vector.load %arg8[%c0_19, %c0_20] : memref<8x128xf32, #tpu.memory_space<vmem>>, vector<8x128xf32>
    tpu.vector_store %arg8[%c0_19, %c0_20], %27 {strides = array<i32>} : memref<8x128xf32, #tpu.memory_space<vmem>>, vector<8x128xf32>,
    return
  }
  func.func @transform_0(%arg0: i32) -> (i32, i32) {
    %c0_i32 = arith.constant 0 : i32
    %c0_i32_0 = arith.constant 0 : i32
    return %arg0, %c0_i32 : i32, i32
  }
  func.func @transform_1(%arg0: i32) -> (i32, i32) {
    %c0_i32 = arith.constant 0 : i32
    %c0_i32_0 = arith.constant 0 : i32
    %c0_i32_1 = arith.constant 0 : i32
    return %c0_i32, %c0_i32_0 : i32, i32
  }
  func.func @transform_2(%arg0: i32) -> (i32, i32) {
    %c0_i32 = arith.constant 0 : i32
    %c0_i32_0 = arith.constant 0 : i32
    %c0_i32_1 = arith.constant 0 : i32
    return %c0_i32, %c0_i32_0 : i32, i32
  }
  func.func @transform_3(%arg0: i32) -> (i32, i32) {
    %c0_i32 = arith.constant 0 : i32
    %c0_i32_0 = arith.constant 0 : i32
    %c0_i32_1 = arith.constant 0 : i32
    return %c0_i32, %c0_i32_0 : i32, i32
  }
  func.func @transform_4(%arg0: i32) -> (i32, i32) {
    %c0_i32 = arith.constant 0 : i32
    %c0_i32_0 = arith.constant 0 : i32
    %c0_i32_1 = arith.constant 0 : i32
    return %c0_i32, %c0_i32_0 : i32, i32
  }
  func.func @transform_5(%arg0: i32) -> (i32, i32) {
    %c0_i32 = arith.constant 0 : i32
    %c0_i32_0 = arith.constant 0 : i32
    %c0_i32_1 = arith.constant 0 : i32
    return %c0_i32, %c0_i32_0 : i32, i32
  }
  func.func @transform_6(%arg0: i32) -> (i32, i32) {
    %c0_i32 = arith.constant 0 : i32
    %c0_i32_0 = arith.constant 0 : i32
    %c0_i32_1 = arith.constant 0 : i32
    return %c0_i32, %c0_i32_0 : i32, i32
  }
  func.func @transform_7(%arg0: i32) -> (i32, i32) {
    %c0_i32 = arith.constant 0 : i32
    %c0_i32_0 = arith.constant 0 : i32
    return %arg0, %c0_i32 : i32, i32
  }
}

module attributes {stable_mosaic.version = 11 : i64} {
  func.func @_fused_mlp_kernel(%arg0: i32, %arg1: memref<8x128xbf16, #tpu.memory_space<vmem>>, %arg2: memref<128x128xbf16, #tpu.memory_space<vmem>>, %arg3: memref<1x128xf32, #tpu.memory_space<vmem>>, %arg4: memref<128x128xbf16, #tpu.memory_space<vmem>>, %arg5: memref<1x128xf32, #tpu.memory_space<vmem>>, %arg6: memref<128x128xbf16, #tpu.memory_space<vmem>>, %arg7: memref<1x128xf32, #tpu.memory_space<vmem>>, %arg8: memref<8x128xf32, #tpu.memory_space<vmem>>) attributes {dimension_semantics = [#tpu.dimension_semantics<parallel>], iteration_bounds = array<i64: 1>, scalar_prefetch = 0 : i64, scratch_operands = 0 : i64, tpu.core_type = #tpu.core_type<tc>, window_params = [{transform_indices = @transform_0, window_bounds = array<i64: 8, 128>}, {pipeline_mode = #tpu.pipeline_mode<synchronous>, transform_indices = @transform_1, window_bounds = array<i64: 128, 128>}, {pipeline_mode = #tpu.pipeline_mode<synchronous>, transform_indices = @transform_2, window_bounds = array<i64: 1, 128>}, {pipeline_mode = #tpu.pipeline_mode<synchronous>, transform_indices = @transform_3, window_bounds = array<i64: 128, 128>}, {pipeline_mode = #tpu.pipeline_mode<synchronous>, transform_indices = @transform_4, window_bounds = array<i64: 1, 128>}, {pipeline_mode = #tpu.pipeline_mode<synchronous>, transform_indices = @transform_5, window_bounds = array<i64: 128, 128>}, {pipeline_mode = #tpu.pipeline_mode<synchronous>, transform_indices = @transform_6, window_bounds = array<i64: 1, 128>}, {transform_indices = @transform_7, window_bounds = array<i64: 8, 128>}]} {
    %c0 = arith.constant 0 : index
    %c0_0 = arith.constant 0 : index
    %0 = vector.load %arg1[%c0, %c0_0] : memref<8x128xbf16, #tpu.memory_space<vmem>>, vector<8x128xbf16>
    %c0_1 = arith.constant 0 : index
    %c0_2 = arith.constant 0 : index
    %1 = vector.load %arg2[%c0_1, %c0_2] : memref<128x128xbf16, #tpu.memory_space<vmem>>, vector<128x128xbf16>
    %c0_3 = arith.constant 0 : index
    %c0_4 = arith.constant 0 : index
    %2 = vector.load %arg3[%c0_3, %c0_4] : memref<1x128xf32, #tpu.memory_space<vmem>>, vector<1x128xf32>
    %cst = arith.constant dense<0.000000e+00> : vector<8x128xf32>
    %3 = tpu.matmul %0, %1, %cst {dimension_numbers = #tpu.dot_dimension_numbers<[1], [0], [0], [1], [0, 0, 1, 1], [], []>} : vector<8x128xbf16>, vector<128x128xbf16>, vector<8x128xf32> -> vector<8x128xf32>
    %4 = vector.broadcast %2 : vector<1x128xf32> to vector<8x128xf32>
    %5 = arith.addf %3, %4 : vector<8x128xf32>
    %cst_5 = arith.constant 0.000000e+00 : f32
    %6 = vector.broadcast %cst_5 : f32 to vector<8x128xf32>
    %7 = arith.cmpf oge, %5, %6 : vector<8x128xf32>
    %cst_6 = arith.constant 2.000000e-02 : f32
    %8 = vector.broadcast %cst_6 : f32 to vector<8x128xf32>
    %9 = arith.mulf %8, %5 : vector<8x128xf32>
    %10 = arith.select %7, %5, %9 : vector<8x128xi1>, vector<8x128xf32>
    %c0_7 = arith.constant 0 : index
    %c0_8 = arith.constant 0 : index
    %11 = vector.load %arg4[%c0_7, %c0_8] : memref<128x128xbf16, #tpu.memory_space<vmem>>, vector<128x128xbf16>
    %c0_9 = arith.constant 0 : index
    %c0_10 = arith.constant 0 : index
    %12 = vector.load %arg5[%c0_9, %c0_10] : memref<1x128xf32, #tpu.memory_space<vmem>>, vector<1x128xf32>
    %13 = arith.truncf %10 : vector<8x128xf32> to vector<8x128xbf16>
    %cst_11 = arith.constant dense<0.000000e+00> : vector<8x128xf32>
    %14 = tpu.matmul %13, %11, %cst_11 {dimension_numbers = #tpu.dot_dimension_numbers<[1], [0], [0], [1], [0, 0, 1, 1], [], []>} : vector<8x128xbf16>, vector<128x128xbf16>, vector<8x128xf32> -> vector<8x128xf32>
    %15 = vector.broadcast %12 : vector<1x128xf32> to vector<8x128xf32>
    %16 = arith.addf %14, %15 : vector<8x128xf32>
    %cst_12 = arith.constant 0.000000e+00 : f32
    %17 = vector.broadcast %cst_12 : f32 to vector<8x128xf32>
    %18 = arith.cmpf oge, %16, %17 : vector<8x128xf32>
    %cst_13 = arith.constant 2.000000e-02 : f32
    %19 = vector.broadcast %cst_13 : f32 to vector<8x128xf32>
    %20 = arith.mulf %19, %16 : vector<8x128xf32>
    %21 = arith.select %18, %16, %20 : vector<8x128xi1>, vector<8x128xf32>
    %c0_14 = arith.constant 0 : index
    %c0_15 = arith.constant 0 : index
    %22 = vector.load %arg6[%c0_14, %c0_15] : memref<128x128xbf16, #tpu.memory_space<vmem>>, vector<128x128xbf16>
    %c0_16 = arith.constant 0 : index
    %c0_17 = arith.constant 0 : index
    %23 = vector.load %arg7[%c0_16, %c0_17] : memref<1x128xf32, #tpu.memory_space<vmem>>, vector<1x128xf32>
    %24 = arith.truncf %21 : vector<8x128xf32> to vector<8x128xbf16>
    %cst_18 = arith.constant dense<0.000000e+00> : vector<8x128xf32>
    %25 = tpu.matmul %24, %22, %cst_18 {dimension_numbers = #tpu.dot_dimension_numbers<[1], [0], [0], [1], [0, 0, 1, 1], [], []>} : vector<8x128xbf16>, vector<128x128xbf16>, vector<8x128xf32> -> vector<8x128xf32>
    %26 = vector.broadcast %23 : vector<1x128xf32> to vector<8x128xf32>
    %27 = arith.addf %25, %26 : vector<8x128xf32>
    %c0_19 = arith.constant 0 : index
    %c0_20 = arith.constant 0 : index
    %28 = vector.load %arg8[%c0_19, %c0_20] : memref<8x128xf32, #tpu.memory_space<vmem>>, vector<8x128xf32>
    tpu.vector_store %arg8[%c0_19, %c0_20], %27 {strides = array<i32>} : memref<8x128xf32, #tpu.memory_space<vmem>>, vector<8x128xf32>,
    return
  }
  func.func @transform_0(%arg0: i32) -> (i32, i32) {
    %c0_i32 = arith.constant 0 : i32
    %c0_i32_0 = arith.constant 0 : i32
    return %arg0, %c0_i32 : i32, i32
  }
  func.func @transform_1(%arg0: i32) -> (i32, i32) {
    %c0_i32 = arith.constant 0 : i32
    %c0_i32_0 = arith.constant 0 : i32
    %c0_i32_1 = arith.constant 0 : i32
    return %c0_i32, %c0_i32_0 : i32, i32
  }
  func.func @transform_2(%arg0: i32) -> (i32, i32) {
    %c0_i32 = arith.constant 0 : i32
    %c0_i32_0 = arith.constant 0 : i32
    %c0_i32_1 = arith.constant 0 : i32
    return %c0_i32, %c0_i32_0 : i32, i32
  }
  func.func @transform_3(%arg0: i32) -> (i32, i32) {
    %c0_i32 = arith.constant 0 : i32
    %c0_i32_0 = arith.constant 0 : i32
    %c0_i32_1 = arith.constant 0 : i32
    return %c0_i32, %c0_i32_0 : i32, i32
  }
  func.func @transform_4(%arg0: i32) -> (i32, i32) {
    %c0_i32 = arith.constant 0 : i32
    %c0_i32_0 = arith.constant 0 : i32
    %c0_i32_1 = arith.constant 0 : i32
    return %c0_i32, %c0_i32_0 : i32, i32
  }
  func.func @transform_5(%arg0: i32) -> (i32, i32) {
    %c0_i32 = arith.constant 0 : i32
    %c0_i32_0 = arith.constant 0 : i32
    %c0_i32_1 = arith.constant 0 : i32
    return %c0_i32, %c0_i32_0 : i32, i32
  }
  func.func @transform_6(%arg0: i32) -> (i32, i32) {
    %c0_i32 = arith.constant 0 : i32
    %c0_i32_0 = arith.constant 0 : i32
    %c0_i32_1 = arith.constant 0 : i32
    return %c0_i32, %c0_i32_0 : i32, i32
  }
  func.func @transform_7(%arg0: i32) -> (i32, i32) {
    %c0_i32 = arith.constant 0 : i32
    %c0_i32_0 = arith.constant 0 : i32
    return %arg0, %c0_i32 : i32, i32
  }
}

</mosaic_0001>

<bundles_post_ra>
// kernel: tpu_custom_call.1
= control target key start
LH: loop header
LB: loop body
LE: loop exit
PB: predicated region body
PF: predicated region fallthrough
CT: control target
= control target key end

     0   :  { %12 = vsyncpa [#allocation3], 0  ;;  %s689_s0 = inlined_call_operand.hbm [shape: bf16[8,128], index: 0, kind: input, shape index: {}]   ;;  %s690_s1 = inlined_call_operand.hbm [shape: bf16[128,128], index: 1, kind: input, shape index: {}]   ;;  %s691_s2 = inlined_call_operand.vmem [shape: f32[1,128], index: 2, kind: input, shape index: {}]   ;;  %s692_s3 = inlined_call_operand.hbm [shape: bf16[128,128], index: 3, kind: input, shape index: {}]   ;;  %s693_s4 = inlined_call_operand.vmem [shape: f32[1,128], index: 4, kind: input, shape index: {}]   ;;  %s694_s5 = inlined_call_operand.hbm [shape: bf16[128,128], index: 5, kind: input, shape index: {}]   ;;  %s695_s6 = inlined_call_operand.vmem [shape: f32[1,128], index: 6, kind: input, shape index: {}]   ;;  %s696_s7 = inlined_call_operand.hbm [shape: f32[8,128], index: 7, kind: output, shape index: {}]  }
   0x1   :  { %13 = vsyncpa [#allocation6], 0 }
   0x2   :  { %14 = vsyncpa [#allocation9], 0  ;;  %s31_s26 = sshll.u32 %s690_s1, 4  ;;  %s32_s26 = int_to_ptr.hbm [resolvable:$true] %s31_s26 }
   0x3   :  { %15 = vsyncpa [#allocation4], 0  ;;  %s618_s27 = smov [#allocation5]   ;;  %s21_s8 = sshll.u32 %s689_s0, 4  ;;  %s22_s8 = int_to_ptr.hbm [resolvable:$true] %s21_s8 }
   0x4   :  { %s33_s28 = sshll.u32 %s618_s27, 4  ;;  %s619_s9 = smov 64   ;;  %s34_s28 = int_to_ptr.vmem [resolvable:$true] %s33_s28 }
   0x5   :  { %s620_s10 = smov 4   ;;  %s621_s11 = smov [#allocation2]  }
   0x6   :  { %39 = dma.hbm_to_vmem [thread:$0]  %s32_s26, 1024, %s34_s28, [#allocation6], %s619_s9, %s619_s9, %s620_s10  }
   0x7   :  { %s23_s12 = sshll.u32 %s621_s11, 4  ;;  %s46_s15 = sshll.u32 %s692_s3, 4  ;;  %s24_s12 = int_to_ptr.vmem [resolvable:$true] %s23_s12  ;;  %s47_s15 = int_to_ptr.hbm [resolvable:$true] %s46_s15 }
   0x8   :  { %26 = dma.hbm_to_vmem [thread:$0]  %s22_s8, 64, %s24_s12, [#allocation3]  }
   0x9   :  { %s61_s17 = sshll.u32 %s694_s5, 4  ;;  %s622_s18 = smov [#allocation7]   ;;  %s62_s17 = int_to_ptr.hbm [resolvable:$true] %s61_s17 }
   0xa   :  { %s48_s19 = sshll.u32 %s622_s18, 4  ;;  %s623_s0 = smov [#allocation8]   ;;  %s49_s19 = int_to_ptr.vmem [resolvable:$true] %s48_s19 }
   0xb   :  { %54 = dma.hbm_to_vmem [thread:$0]  %s47_s15, 1024, %s49_s19, [#allocation6], %s619_s9, %s619_s9, %s620_s10  }
   0xc   :  { %s63_s20 = sshll.u32 %s623_s0, 4  ;;  %s64_s20 = int_to_ptr.vmem [resolvable:$true] %s63_s20 }
   0xd   :  { %69 = dma.hbm_to_vmem [thread:$0]  %s62_s17, 1024, %s64_s20, [#allocation9], %s619_s9, %s619_s9, %s620_s10  }
   0xe   :  { %610 = dma.done.wait [#allocation3], 64  }
   0xf   :  { %611 = vsyncadd [#allocation3], 4294967232 }
  0x10   :  { %612 = dma.done.wait [#allocation6], 2048  }
  0x11   :  { %613 = vsyncadd [#allocation6], 4294965248 }
  0x12   :  { %614 = dma.done.wait [#allocation9], 1024  }
  0x13   :  { %615 = vsyncadd [#allocation9], 4294966272  ;;  %v463_v0 = vld [vmem:[#allocation5 + $0x38] sm:$0xff]  ;;  %v462_v1 = vld [vmem:[#allocation5 + $0x30] sm:$0xff]  ;;  %s624_s24 = smov [#allocation10]   ;;  %s348_s28 = sshll.u32 %s696_s7, 4  ;;  %s349_s28 = int_to_ptr.hbm [resolvable:$true] %s348_s28 }
  0x14   :  { %157 = vmatpush.bf16.msra.mxu0 %v463_v0  ;;  %v471_v2 = vld [vmem:[#allocation7 + $0x38] sm:$0xff]  ;;  %v470_v3 = vld [vmem:[#allocation7 + $0x30] sm:$0xff]  ;;  %v461_v4 = vld [vmem:[#allocation5 + $0x28] sm:$0xff]  ;;  %s346_s25 = sshll.u32 %s624_s24, 4  ;;  %s347_s25 = int_to_ptr.vmem [resolvable:$true] %s346_s25 }
  0x15   :  { %242 = vmatpush.bf16.msra.mxu1 %v471_v2  ;;  %v469_v5 = vld [vmem:[#allocation7 + $0x28] sm:$0xff]  ;;  %v460_v6 = vld [vmem:[#allocation5 + $0x20] sm:$0xff]  ;;  %v459_v8 = vld [vmem:[#allocation5 + $0x18] sm:$0xff] }
  0x16   :  { %v468_v7 = vld [vmem:[#allocation7 + $0x20] sm:$0xff]  ;;  %v467_v9 = vld [vmem:[#allocation7 + $0x18] sm:$0xff]  ;;  %v458_v10 = vld [vmem:[#allocation5 + $0x10] sm:$0xff] }
  0x17   :  { %v466_v11 = vld [vmem:[#allocation7 + $0x10] sm:$0xff]  ;;  %v457_v12 = vld [vmem:[#allocation5 + $0x8] sm:$0xff]  ;;  %v456_v13 = vld [vmem:[#allocation5] sm:$0xff] }
  0x18   :  { %158 = vmatpush.bf16.msra.mxu0 %v462_v1  ;;  %v88_v14 = vld [vmem:[#allocation2] sm:$0xf]  ;;  %v465_v15 = vld [vmem:[#allocation7 + $0x8] sm:$0xff]  ;;  %v464_v16 = vld [vmem:[#allocation7] sm:$0xff] }
  0x19   :  { %243 = vmatpush.bf16.msra.mxu1 %v470_v3  ;;  %v479_v17 = vld [vmem:[#allocation8 + $0x38] sm:$0xff]  ;;  %v478_v18 = vld [vmem:[#allocation8 + $0x30] sm:$0xff]  ;;  %v477_v19 = vld [vmem:[#allocation8 + $0x28] sm:$0xff] }
  0x1a   :  { %327 = vmatpush.bf16.msra.mxu2 %v479_v17  ;;  %v476_v20 = vld [vmem:[#allocation8 + $0x20] sm:$0xff]  ;;  %v475_v21 = vld [vmem:[#allocation8 + $0x18] sm:$0xff]  ;;  %v474_v22 = vld [vmem:[#allocation8 + $0x10] sm:$0xff] }
  0x1b   :  { %v487_v23 = vld [vmem:[%s691_s2] ss:$0 sm:$0xff]  ;;  %v473_v30 = vld [vmem:[#allocation8 + $0x8] sm:$0xff]  ;;  %v472_v31 = vld [vmem:[#allocation8] sm:$0xff] }
  0x1c   :  { %159 = vmatpush.bf16.msra.mxu0 %v461_v4  ;;  %v488_v32 = vld [vmem:[%s693_s4] ss:$0 sm:$0xff] }
  0x1d   :  { %244 = vmatpush.bf16.msra.mxu1 %v469_v5  ;;  %v489_v39 = vld [vmem:[%s695_s6] ss:$0 sm:$0xff] }
  0x1e   :  { %328 = vmatpush.bf16.msra.mxu2 %v478_v18 }
  0x20   :  { %160 = vmatpush.bf16.msra.mxu0 %v460_v6 }
  0x21   :  { %245 = vmatpush.bf16.msra.mxu1 %v468_v7 }
  0x22   :  { %329 = vmatpush.bf16.msra.mxu2 %v477_v19 }
  0x24   :  { %161 = vmatpush.bf16.msra.mxu0 %v459_v8 }
  0x25   :  { %246 = vmatpush.bf16.msra.mxu1 %v467_v9 }
  0x26   :  { %330 = vmatpush.bf16.msra.mxu2 %v476_v20 }
  0x28   :  { %162 = vmatpush.bf16.msra.mxu0 %v458_v10 }
  0x29   :  { %247 = vmatpush.bf16.msra.mxu1 %v466_v11 }
  0x2a   :  { %331 = vmatpush.bf16.msra.mxu2 %v475_v21 }
  0x2c   :  { %163 = vmatpush.bf16.msra.mxu0 %v457_v12 }
  0x2d   :  { %248 = vmatpush.bf16.msra.mxu1 %v465_v15 }
  0x2e   :  { %332 = vmatpush.bf16.msra.mxu2 %v474_v22 }
  0x30   :  { %164 = vmatpush.bf16.msra.mxu0 %v456_v13 }
  0x31   :  { %249 = vmatpush.bf16.msra.mxu1 %v464_v16 }
  0x32   :  { %333 = vmatpush.bf16.msra.mxu2 %v473_v30 }
  0x33   :  { %165 = vmatmul.bf16.vlgmr.msra.gmra.mxu0 %v88_v14 }
  0x36   :  { %334 = vmatpush.bf16.msra.mxu2 %v472_v31 }
  0xb0   :  { %v166_v24 = vpop.f32.mrf.mxu0 }
  0xb1   :  { %v167_v25 = vadd.f32 %v487_v23, %v166_v24 }
  0xb3   :  { %v171_v26 = vmul.f32 0.02, %v167_v25  ;;  %vm170_vm0 = vcmp.ge.f32.partialorder %v167_v25, 0.0 }
  0xb5   :  { %v172_v27 = vsel %vm170_vm0, %v167_v25, %v171_v26 }
  0xb6   :  { %v190_v28 = vpack.c.bf16 %v172_v27, %v172_v27 }
  0xb8   :  { %v168_v29 = vpop.f32.mrf.mxu0  ;;  %250 = vmatmul.bf16.vlgmr.msra.gmra.mxu1 %v190_v28 }
 0x135   :  { %v251_v33 = vpop.f32.mrf.mxu1 }
 0x136   :  { %v252_v34 = vadd.f32 %v488_v32, %v251_v33 }
 0x138   :  { %v256_v35 = vmul.f32 0.02, %v252_v34  ;;  %vm255_vm1 = vcmp.ge.f32.partialorder %v252_v34, 0.0 }
 0x13a   :  { %v257_v36 = vsel %vm255_vm1, %v252_v34, %v256_v35 }
 0x13b   :  { %v275_v37 = vpack.c.bf16 %v257_v36, %v257_v36 }
 0x13d   :  { %v253_v38 = vpop.f32.mrf.mxu1  ;;  %335 = vmatmul.bf16.vlgmr.msra.gmra.mxu2 %v275_v37 }
 0x1c0   :  { %v336_v40 = vpop.f32.mrf.mxu2 }
 0x1c1   :  { %v337_v41 = vadd.f32 %v489_v39, %v336_v40 }
 0x1c3   :  { %340 = vst [vmem:[#allocation10] sm:$0xff] %v337_v41 }
 0x1c4   :  { %351 = dma.vmem_to_hbm [thread:$0]  %s347_s25, 128, %s349_s28, [#allocation4]  }
 0x1c8   :  { %v338_v42 = vpop.f32.mrf.mxu2 }
 0x1c9   :  { %616 = dma.done.wait [#allocation4], 128  }
 0x1ca   :  { %617 = vsyncadd [#allocation4], 4294967168 }
 0x1cb   :  { %356 = vsyncpa [#allocation3], 1 }
 0x1cc   :  { %357 = vsyncpa [#allocation6], 1 }
 0x1cd   :  { %358 = vsyncpa [#allocation9], 1 }
 0x1ce   :  { %359 = vsyncpa [#allocation4], 1 }

// kernel: tpu_custom_call.1
= control target key start
LH: loop header
LB: loop body
LE: loop exit
PB: predicated region body
PF: predicated region fallthrough
CT: control target
= control target key end

     0   :  { %12 = vsyncpa [#allocation3], 0  ;;  %s689_s0 = inlined_call_operand.hbm [shape: bf16[8,128], index: 0, kind: input, shape index: {}]   ;;  %s690_s1 = inlined_call_operand.hbm [shape: bf16[128,128], index: 1, kind: input, shape index: {}]   ;;  %s691_s2 = inlined_call_operand.vmem [shape: f32[1,128], index: 2, kind: input, shape index: {}]   ;;  %s692_s3 = inlined_call_operand.hbm [shape: bf16[128,128], index: 3, kind: input, shape index: {}]   ;;  %s693_s4 = inlined_call_operand.vmem [shape: f32[1,128], index: 4, kind: input, shape index: {}]   ;;  %s694_s5 = inlined_call_operand.hbm [shape: bf16[128,128], index: 5, kind: input, shape index: {}]   ;;  %s695_s6 = inlined_call_operand.vmem [shape: f32[1,128], index: 6, kind: input, shape index: {}]   ;;  %s696_s7 = inlined_call_operand.hbm [shape: f32[8,128], index: 7, kind: output, shape index: {}]  }
   0x1   :  { %13 = vsyncpa [#allocation6], 0 }
   0x2   :  { %14 = vsyncpa [#allocation9], 0  ;;  %s31_s26 = sshll.u32 %s690_s1, 4  ;;  %s32_s26 = int_to_ptr.hbm [resolvable:$true] %s31_s26 }
   0x3   :  { %15 = vsyncpa [#allocation4], 0  ;;  %s618_s27 = smov [#allocation5]   ;;  %s21_s8 = sshll.u32 %s689_s0, 4  ;;  %s22_s8 = int_to_ptr.hbm [resolvable:$true] %s21_s8 }
   0x4   :  { %s33_s28 = sshll.u32 %s618_s27, 4  ;;  %s619_s9 = smov 64   ;;  %s34_s28 = int_to_ptr.vmem [resolvable:$true] %s33_s28 }
   0x5   :  { %s620_s10 = smov 4   ;;  %s621_s11 = smov [#allocation2]  }
   0x6   :  { %39 = dma.hbm_to_vmem [thread:$0]  %s32_s26, 1024, %s34_s28, [#allocation6], %s619_s9, %s619_s9, %s620_s10  }
   0x7   :  { %s23_s12 = sshll.u32 %s621_s11, 4  ;;  %s46_s15 = sshll.u32 %s692_s3, 4  ;;  %s24_s12 = int_to_ptr.vmem [resolvable:$true] %s23_s12  ;;  %s47_s15 = int_to_ptr.hbm [resolvable:$true] %s46_s15 }
   0x8   :  { %26 = dma.hbm_to_vmem [thread:$0]  %s22_s8, 64, %s24_s12, [#allocation3]  }
   0x9   :  { %s61_s17 = sshll.u32 %s694_s5, 4  ;;  %s622_s18 = smov [#allocation7]   ;;  %s62_s17 = int_to_ptr.hbm [resolvable:$true] %s61_s17 }
   0xa   :  { %s48_s19 = sshll.u32 %s622_s18, 4  ;;  %s623_s0 = smov [#allocation8]   ;;  %s49_s19 = int_to_ptr.vmem [resolvable:$true] %s48_s19 }
   0xb   :  { %54 = dma.hbm_to_vmem [thread:$0]  %s47_s15, 1024, %s49_s19, [#allocation6], %s619_s9, %s619_s9, %s620_s10  }
   0xc   :  { %s63_s20 = sshll.u32 %s623_s0, 4  ;;  %s64_s20 = int_to_ptr.vmem [resolvable:$true] %s63_s20 }
   0xd   :  { %69 = dma.hbm_to_vmem [thread:$0]  %s62_s17, 1024, %s64_s20, [#allocation9], %s619_s9, %s619_s9, %s620_s10  }
   0xe   :  { %610 = dma.done.wait [#allocation3], 64  }
   0xf   :  { %611 = vsyncadd [#allocation3], 4294967232 }
  0x10   :  { %612 = dma.done.wait [#allocation6], 2048  }
  0x11   :  { %613 = vsyncadd [#allocation6], 4294965248 }
  0x12   :  { %614 = dma.done.wait [#allocation9], 1024  }
  0x13   :  { %615 = vsyncadd [#allocation9], 4294966272  ;;  %v463_v0 = vld [vmem:[#allocation5 + $0x38] sm:$0xff]  ;;  %v462_v1 = vld [vmem:[#allocation5 + $0x30] sm:$0xff]  ;;  %s624_s24 = smov [#allocation10]   ;;  %s348_s28 = sshll.u32 %s696_s7, 4  ;;  %s349_s28 = int_to_ptr.hbm [resolvable:$true] %s348_s28 }
  0x14   :  { %157 = vmatpush.bf16.msra.mxu0 %v463_v0  ;;  %v471_v2 = vld [vmem:[#allocation7 + $0x38] sm:$0xff]  ;;  %v470_v3 = vld [vmem:[#allocation7 + $0x30] sm:$0xff]  ;;  %v461_v4 = vld [vmem:[#allocation5 + $0x28] sm:$0xff]  ;;  %s346_s25 = sshll.u32 %s624_s24, 4  ;;  %s347_s25 = int_to_ptr.vmem [resolvable:$true] %s346_s25 }
  0x15   :  { %242 = vmatpush.bf16.msra.mxu1 %v471_v2  ;;  %v469_v5 = vld [vmem:[#allocation7 + $0x28] sm:$0xff]  ;;  %v460_v6 = vld [vmem:[#allocation5 + $0x20] sm:$0xff]  ;;  %v459_v8 = vld [vmem:[#allocation5 + $0x18] sm:$0xff] }
  0x16   :  { %v468_v7 = vld [vmem:[#allocation7 + $0x20] sm:$0xff]  ;;  %v467_v9 = vld [vmem:[#allocation7 + $0x18] sm:$0xff]  ;;  %v458_v10 = vld [vmem:[#allocation5 + $0x10] sm:$0xff] }
  0x17   :  { %v466_v11 = vld [vmem:[#allocation7 + $0x10] sm:$0xff]  ;;  %v457_v12 = vld [vmem:[#allocation5 + $0x8] sm:$0xff]  ;;  %v456_v13 = vld [vmem:[#allocation5] sm:$0xff] }
  0x18   :  { %158 = vmatpush.bf16.msra.mxu0 %v462_v1  ;;  %v88_v14 = vld [vmem:[#allocation2] sm:$0xf]  ;;  %v465_v15 = vld [vmem:[#allocation7 + $0x8] sm:$0xff]  ;;  %v464_v16 = vld [vmem:[#allocation7] sm:$0xff] }
  0x19   :  { %243 = vmatpush.bf16.msra.mxu1 %v470_v3  ;;  %v479_v17 = vld [vmem:[#allocation8 + $0x38] sm:$0xff]  ;;  %v478_v18 = vld [vmem:[#allocation8 + $0x30] sm:$0xff]  ;;  %v477_v19 = vld [vmem:[#allocation8 + $0x28] sm:$0xff] }
  0x1a   :  { %327 = vmatpush.bf16.msra.mxu2 %v479_v17  ;;  %v476_v20 = vld [vmem:[#allocation8 + $0x20] sm:$0xff]  ;;  %v475_v21 = vld [vmem:[#allocation8 + $0x18] sm:$0xff]  ;;  %v474_v22 = vld [vmem:[#allocation8 + $0x10] sm:$0xff] }
  0x1b   :  { %v487_v23 = vld [vmem:[%s691_s2] ss:$0 sm:$0xff]  ;;  %v473_v30 = vld [vmem:[#allocation8 + $0x8] sm:$0xff]  ;;  %v472_v31 = vld [vmem:[#allocation8] sm:$0xff] }
  0x1c   :  { %159 = vmatpush.bf16.msra.mxu0 %v461_v4  ;;  %v488_v32 = vld [vmem:[%s693_s4] ss:$0 sm:$0xff] }
  0x1d   :  { %244 = vmatpush.bf16.msra.mxu1 %v469_v5  ;;  %v489_v39 = vld [vmem:[%s695_s6] ss:$0 sm:$0xff] }
  0x1e   :  { %328 = vmatpush.bf16.msra.mxu2 %v478_v18 }
  0x20   :  { %160 = vmatpush.bf16.msra.mxu0 %v460_v6 }
  0x21   :  { %245 = vmatpush.bf16.msra.mxu1 %v468_v7 }
  0x22   :  { %329 = vmatpush.bf16.msra.mxu2 %v477_v19 }
  0x24   :  { %161 = vmatpush.bf16.msra.mxu0 %v459_v8 }
  0x25   :  { %246 = vmatpush.bf16.msra.mxu1 %v467_v9 }
  0x26   :  { %330 = vmatpush.bf16.msra.mxu2 %v476_v20 }
  0x28   :  { %162 = vmatpush.bf16.msra.mxu0 %v458_v10 }
  0x29   :  { %247 = vmatpush.bf16.msra.mxu1 %v466_v11 }
  0x2a   :  { %331 = vmatpush.bf16.msra.mxu2 %v475_v21 }
  0x2c   :  { %163 = vmatpush.bf16.msra.mxu0 %v457_v12 }
  0x2d   :  { %248 = vmatpush.bf16.msra.mxu1 %v465_v15 }
  0x2e   :  { %332 = vmatpush.bf16.msra.mxu2 %v474_v22 }
  0x30   :  { %164 = vmatpush.bf16.msra.mxu0 %v456_v13 }
  0x31   :  { %249 = vmatpush.bf16.msra.mxu1 %v464_v16 }
  0x32   :  { %333 = vmatpush.bf16.msra.mxu2 %v473_v30 }
  0x33   :  { %165 = vmatmul.bf16.vlgmr.msra.gmra.mxu0 %v88_v14 }
  0x36   :  { %334 = vmatpush.bf16.msra.mxu2 %v472_v31 }
  0xb0   :  { %v166_v24 = vpop.f32.mrf.mxu0 }
  0xb1   :  { %v167_v25 = vadd.f32 %v487_v23, %v166_v24 }
  0xb3   :  { %v171_v26 = vmul.f32 0.02, %v167_v25  ;;  %vm170_vm0 = vcmp.ge.f32.partialorder %v167_v25, 0.0 }
  0xb5   :  { %v172_v27 = vsel %vm170_vm0, %v167_v25, %v171_v26 }
  0xb6   :  { %v190_v28 = vpack.c.bf16 %v172_v27, %v172_v27 }
  0xb8   :  { %v168_v29 = vpop.f32.mrf.mxu0  ;;  %250 = vmatmul.bf16.vlgmr.msra.gmra.mxu1 %v190_v28 }
 0x135   :  { %v251_v33 = vpop.f32.mrf.mxu1 }
 0x136   :  { %v252_v34 = vadd.f32 %v488_v32, %v251_v33 }
 0x138   :  { %v256_v35 = vmul.f32 0.02, %v252_v34  ;;  %vm255_vm1 = vcmp.ge.f32.partialorder %v252_v34, 0.0 }
 0x13a   :  { %v257_v36 = vsel %vm255_vm1, %v252_v34, %v256_v35 }
 0x13b   :  { %v275_v37 = vpack.c.bf16 %v257_v36, %v257_v36 }
 0x13d   :  { %v253_v38 = vpop.f32.mrf.mxu1  ;;  %335 = vmatmul.bf16.vlgmr.msra.gmra.mxu2 %v275_v37 }
 0x1c0   :  { %v336_v40 = vpop.f32.mrf.mxu2 }
 0x1c1   :  { %v337_v41 = vadd.f32 %v489_v39, %v336_v40 }
 0x1c3   :  { %340 = vst [vmem:[#allocation10] sm:$0xff] %v337_v41 }
 0x1c4   :  { %351 = dma.vmem_to_hbm [thread:$0]  %s347_s25, 128, %s349_s28, [#allocation4]  }
 0x1c8   :  { %v338_v42 = vpop.f32.mrf.mxu2 }
 0x1c9   :  { %616 = dma.done.wait [#allocation4], 128  }
 0x1ca   :  { %617 = vsyncadd [#allocation4], 4294967168 }
 0x1cb   :  { %356 = vsyncpa [#allocation3], 1 }
 0x1cc   :  { %357 = vsyncpa [#allocation6], 1 }
 0x1cd   :  { %358 = vsyncpa [#allocation9], 1 }
 0x1ce   :  { %359 = vsyncpa [#allocation4], 1 }

</bundles_post_ra>
